<compile_context>
chip_gen: v5e
topology: v5e:2x2
jax: 0.10.0
libtpu: 0.0.40
codegen_flags: <defaults>
</compile_context>

<pallas_src>
import jax
import jax.numpy as jnp
from jax import lax
from jax.experimental import pallas as pl
from jax.experimental.pallas import tpu as pltpu


_LANE = 128
_MAX_TK = 16 * 1024            # upper bound on the lane tile (perf review #1)


def _round_up(x, n):
    return ((x + n - 1) // n) * n


def _vmem_budgets():
    """Generation-aware VMEM sizing (perf review #4).

    Returns (vmem_limit_bytes, streamed_window_budget_bytes)."""
    try:
        cap = int(pltpu.get_tpu_info().vmem_capacity_bytes)
    except Exception:
        cap = 64 * 1024 * 1024                         # conservative (v7x)
    limit = min(cap * 3 // 5, 96 * 1024 * 1024)        # e.g. 38 MiB v7x, 76 MiB v6e
    stream_budget = min(cap // 4, 32 * 1024 * 1024)    # e.g. 16 MiB v7x, 32 MiB v6e
    return int(limit), int(stream_budget)


def _num_core_splits():
    """2-way reduction split on v7x (2 TensorCores/chip); 1 on v5e/v6e."""
    try:
        kind = jax.devices()[0].device_kind.lower()
    except Exception:
        return 1
    return 2 if ("v7" in kind or "7x" in kind) else 1


def _choose_tile(m, bytes_per_lane, budget_bytes):
    """Pick (TK, padded_per_split_M).

    TK is a multiple of 128, <= _MAX_TK, such that the VMEM consumed per lane
    column (`bytes_per_lane`, double-buffer factor already included) stays
    under `budget_bytes`.  Prefers exact divisors of the 128-rounded M (zero
    extra padding); otherwise pads M up to a multiple of a large power-of-two
    tile (padding with zeros is numerically exact for every use here)."""
    tk_max = (budget_bytes // max(bytes_per_lane, 1)) // _LANE * _LANE
    tk_max = max(_LANE, min(_MAX_TK, tk_max))
    m128 = _round_up(m, _LANE)
    if m128 <= tk_max:
        return m128, m128                      # single block per split
    # Largest multiple-of-128 divisor of m128 that fits the budget.
    best = _LANE
    d = _LANE
    while d <= tk_max:
        if m128 % d == 0:
            best = d
        d += _LANE
    if best >= tk_max // 4:                    # divisor keeps step count low
        return best, m128
    # Otherwise accept modest zero padding with a big power-of-two tile.
    tk = _LANE
    while tk * 2 <= tk_max:
        tk *= 2
    return tk, _round_up(m128, tk)


# ----------------------------------------------------------------------------
# Kernels (per-core partial reductions; finalize happens in cheap XLA ops)
# ----------------------------------------------------------------------------
def _cov_partial_kernel(f_ref, gram_ref, rsum_ref):
    """Accumulate partial Gram (C,C) and channel row-sums (C,1) over the
    spatial reduction axis (grid axis 1).  Outputs stay VMEM-resident across
    the reduction and are written back once per split."""
    k = pl.program_id(1)

    @pl.when(k == 0)
    def _init():
        gram_ref[...] = jnp.zeros_like(gram_ref)
        rsum_ref[...] = jnp.zeros_like(rsum_ref)

    fb = f_ref[...]                                      # (C, TK), native dtype
    # Contract the spatial (lane) axis of BOTH operands: feeds the MXU
    # directly, no F.T copy materialised in VMEM.
    gram_ref[...] += lax.dot_general(
        fb, fb,
        dimension_numbers=(((1,), (1,)), ((), ())),
        preferred_element_type=jnp.float32)
    rsum_ref[...] += jnp.sum(fb.astype(jnp.float32), axis=1, keepdims=True)


def _raw_partial_kernel(s_ref, t_ref, out_ref, acc_ref):
    """Partial sum of squared differences.  Per-step work is pure VPU
    (elementwise accumulate); the only cross-lane reduction runs once at the
    end of the split (perf review #8)."""
    k = pl.program_id(1)

    @pl.when(k == 0)
    def _init():
        acc_ref[...] = jnp.zeros_like(acc_ref)

    d = s_ref[...].astype(jnp.float32) - t_ref[...].astype(jnp.float32)
    acc_ref[...] += d * d

    @pl.when(k == pl.num_programs(1) - 1)
    def _finalize():
        out_ref[...] = jnp.sum(acc_ref[...], keepdims=True)


# ----------------------------------------------------------------------------
# pallas_call wrappers
# ----------------------------------------------------------------------------
def _cov_partials(F):
    """F: (C, M) activation slab, native dtype.
    Returns (gram_parts (nsplit,C,C) f32, rowsum_parts (nsplit,C,1) f32)."""
    c, m = F.shape
    itemsize = F.dtype.itemsize
    nsplit = _num_core_splits()
    vmem_limit, budget = _vmem_budgets()

    m_per_split = -(-m // nsplit)
    tk, m_split_pad = _choose_tile(m_per_split, 2 * c * itemsize, budget)
    tiles = m_split_pad // tk
    m_pad = nsplit * m_split_pad
    if m_pad != m:
        F = jnp.pad(F, ((0, 0), (0, m_pad - m)))         # zeros: exact for Gram/sum

    cost = pl.CostEstimate(
        flops=int(2 * c * c * m_pad + 2 * c * m_pad),
        transcendentals=0,
        bytes_accessed=int(c * m_pad * itemsize + nsplit * (c * c + c) * 4))

    gram, rsum = pl.pallas_call(
        _cov_partial_kernel,
        grid=(nsplit, tiles),
        in_specs=[pl.BlockSpec((c, tk), lambda s, k: (0, s * tiles + k))],
        out_specs=[pl.BlockSpec((None, c, c), lambda s, k: (s, 0, 0)),
                   pl.BlockSpec((None, c, 1), lambda s, k: (s, 0, 0))],
        out_shape=[jax.ShapeDtypeStruct((nsplit, c, c), jnp.float32),
                   jax.ShapeDtypeStruct((nsplit, c, 1), jnp.float32)],
        compiler_params=pltpu.CompilerParams(
            dimension_semantics=("parallel", "arbitrary"),
            vmem_limit_bytes=vmem_limit),
        cost_estimate=cost,
    )(F)
    return gram, rsum


def covariance_matrix(source_nchw, stream_dtype=None):
    """JAX/Pallas port of CovarianceMatrix.forward.  `stream_dtype=bfloat16`
    halves the HBM traffic on v5e (accumulation stays f32)."""
    one, c, h, w = source_nchw.shape
    assert one == 1, "CovarianceMatrix requires batch == 1 (PyTorch view semantics)"
    m = h * w
    F = source_nchw.reshape(c, m)
    if stream_dtype is not None:
        F = F.astype(stream_dtype)
    gram_parts, rsum_parts = _cov_partials(F)
    gram = jnp.sum(gram_parts, axis=0)                   # (C, C)
    a = jnp.sum(rsum_parts, axis=0) / m                  # (C, 1), unpadded m
    return (gram / m - a * a.T) / c                      # (C, C) f32


def _cov_mse(source_nchw, target_cov, stream_dtype=None):
    g = covariance_matrix(source_nchw, stream_dtype)
    diff = g - target_cov.astype(jnp.float32)
    return jnp.mean(diff * diff)                         # tiny (C,C) XLA finalize


def _raw_mse(source, target_2d):
    rows, m = target_2d.shape
    s2 = source.reshape(rows, m)
    it_s = s2.dtype.itemsize
    it_t = target_2d.dtype.itemsize
    nsplit = _num_core_splits()
    vmem_limit, budget = _vmem_budgets()

    # Bytes per lane column: 2 double-buffered streamed operands + f32 acc.
    bpl = 2 * rows * (it_s + it_t) + rows * 4
    m_per_split = -(-m // nsplit)
    tk, m_split_pad = _choose_tile(m_per_split, bpl, budget)
    tiles = m_split_pad // tk
    m_pad = nsplit * m_split_pad
    if m_pad != m:                                       # identical zero pad on
        pad = ((0, 0), (0, m_pad - m))                   # both operands -> diff 0
        s2 = jnp.pad(s2, pad)
        target_2d = jnp.pad(target_2d, pad)

    parts = pl.pallas_call(
        _raw_partial_kernel,
        grid=(nsplit, tiles),
        in_specs=[pl.BlockSpec((rows, tk), lambda s, k: (0, s * tiles + k)),
                  pl.BlockSpec((rows, tk), lambda s, k: (0, s * tiles + k))],
        out_specs=pl.BlockSpec((None, 1, 1), lambda s, k: (s, 0, 0)),
        out_shape=jax.ShapeDtypeStruct((nsplit, 1, 1), jnp.float32),
        scratch_shapes=[pltpu.VMEM((rows, tk), jnp.float32)],
        compiler_params=pltpu.CompilerParams(
            dimension_semantics=("parallel", "arbitrary"),
            vmem_limit_bytes=vmem_limit),
        cost_estimate=pl.CostEstimate(
            flops=int(3 * rows * m_pad),
            transcendentals=0,
            bytes_accessed=int(rows * m_pad * (it_s + it_t) + nsplit * 4)),
    )(s2, target_2d)
    return jnp.sum(parts) / (rows * m)                   # unpadded element count


class LayerLoss:
    """JAX/Pallas port of the PyTorch LayerLoss module (forward pass)."""

    def __init__(self, description, raw_target, activation_shift=0.0,
                 stream_dtype=None):
        self.description = description
        self.stream_dtype = stream_dtype
        raw_target = jnp.asarray(raw_target)
        if description == "raw":
            one, c, h, w = raw_target.shape
            self.target = raw_target.reshape(one * c, h * w)
        elif description == "covariance":
            self.target = covariance_matrix(raw_target, stream_dtype)   # (C,C) f32
        else:
            raise ValueError(f"unknown description: {description}")

    def __call__(self, source):
        source = jnp.asarray(source)
        if self.description == "raw":
            return _raw_mse(source, self.target)
        return _cov_mse(source, self.target, self.stream_dtype)


# ----------------------------------------------------------------------------
# Pure-JAX reference (correctness check)
# ----------------------------------------------------------------------------
def _ref_cov(x):
    one, c, h, w = x.shape
    m = h * w
    F = x.reshape(c, m).astype(jnp.float32)
    A = jnp.mean(F, axis=1, keepdims=True)
    G = jnp.dot(F, F.T, precision=lax.Precision.HIGHEST) / m - A * A.T
    return G / c


def _ref_layer_loss(description, src, tgt):
    if description == "raw":
        return jnp.mean((src.astype(jnp.float32) - tgt.astype(jnp.float32)) ** 2)
    return jnp.mean((_ref_cov(src) - _ref_cov(tgt)) ** 2)


# ----------------------------------------------------------------------------
if __name__ == "__main__":
    key = jax.random.PRNGKey(0)
    shapes = [
        (1, 16, 64, 64),   # M=4096, lane aligned -> multi-step reduction grid
        (1, 8, 16, 16),    # M=256  small, single tile per split
        (1, 8, 10, 10),    # M=100  not lane aligned -> zero-padding path
    ]
    ok = True
    for shp in shapes:
        key, k1, k2 = jax.random.split(key, 3)
        raw_target = jax.random.normal(k1, shp, dtype=jnp.float32)
        source = 1.5 * jax.random.normal(k2, shp, dtype=jnp.float32) + 0.3

        # covariance kernel vs reference
        cov_k = jax.block_until_ready(covariance_matrix(raw_target))
        cov_r = _ref_cov(raw_target)
        ok &= bool(jnp.allclose(cov_k, cov_r, rtol=5e-3, atol=1e-5))

        for desc in ("covariance", "raw"):
            mod = LayerLoss(desc, raw_target)
            out = jax.block_until_ready(mod(source))
            ref = _ref_layer_loss(desc, source, raw_target)
            ok &= bool(jnp.isfinite(out))
            ok &= bool(jnp.allclose(out, ref, rtol=2e-2, atol=1e-7))

    if ok:
        print("KERNEL_OK")
</pallas_src>

<mosaic_0001>
module attributes {stable_mosaic.version = 11 : i64} {
  func.func @_cov_partial_kernel(%arg0: i32, %arg1: i32, %arg2: memref<16x4096xf32, #tpu.memory_space<vmem>>, %arg3: memref<1x16x16xf32, #tpu.memory_space<vmem>>, %arg4: memref<1x16x1xf32, #tpu.memory_space<vmem>>) attributes {dimension_semantics = [#tpu.dimension_semantics<parallel>, #tpu.dimension_semantics<arbitrary>], iteration_bounds = array<i64: 1, 1>, scalar_prefetch = 0 : i64, scratch_operands = 0 : i64, tpu.core_type = #tpu.core_type<tc>, window_params = [{transform_indices = @transform_0, window_bounds = array<i64: 16, 4096>}, {transform_indices = @transform_1, window_bounds = array<i64: 1, 16, 16>}, {transform_indices = @transform_2, window_bounds = array<i64: 1, 16, 1>}]} {
    %c0_i32 = arith.constant 0 : i32
    %0 = arith.cmpi eq, %arg1, %c0_i32 : i32
    %1 = arith.extui %0 : i1 to i32
    %c0_i32_0 = arith.constant 0 : i32
    %2 = arith.cmpi ne, %1, %c0_i32_0 : i32
    scf.if %2 {
      %cst_15 = arith.constant 0.000000e+00 : f32
      %19 = vector.broadcast %cst_15 : f32 to vector<16x16xf32>
      %c0_16 = arith.constant 0 : index
      %c0_17 = arith.constant 0 : index
      %c0_18 = arith.constant 0 : index
      %20 = vector.load %arg3[%c0_16, %c0_17, %c0_18] : memref<1x16x16xf32, #tpu.memory_space<vmem>>, vector<1x16x16xf32>
      %21 = vector.shape_cast %20 : vector<1x16x16xf32> to vector<16x16xf32>
      %22 = vector.shape_cast %19 : vector<16x16xf32> to vector<1x16x16xf32>
      tpu.vector_store %arg3[%c0_16, %c0_17, %c0_18], %22 {strides = array<i32>} : memref<1x16x16xf32, #tpu.memory_space<vmem>>, vector<1x16x16xf32>,
      %cst_19 = arith.constant 0.000000e+00 : f32
      %23 = vector.broadcast %cst_19 : f32 to vector<16x1xf32>
      %c0_20 = arith.constant 0 : index
      %c0_21 = arith.constant 0 : index
      %c0_22 = arith.constant 0 : index
      %24 = vector.load %arg4[%c0_20, %c0_21, %c0_22] : memref<1x16x1xf32, #tpu.memory_space<vmem>>, vector<1x16x1xf32>
      %25 = vector.shape_cast %24 : vector<1x16x1xf32> to vector<16x1xf32>
      %26 = vector.shape_cast %23 : vector<16x1xf32> to vector<1x16x1xf32>
      tpu.vector_store %arg4[%c0_20, %c0_21, %c0_22], %26 {strides = array<i32>} : memref<1x16x1xf32, #tpu.memory_space<vmem>>, vector<1x16x1xf32>,
    } else {
    }
    %c0 = arith.constant 0 : index
    %c0_1 = arith.constant 0 : index
    %3 = vector.load %arg2[%c0, %c0_1] : memref<16x4096xf32, #tpu.memory_space<vmem>>, vector<16x4096xf32>
    %c0_2 = arith.constant 0 : index
    %c0_3 = arith.constant 0 : index
    %c0_4 = arith.constant 0 : index
    %4 = vector.load %arg3[%c0_2, %c0_3, %c0_4] : memref<1x16x16xf32, #tpu.memory_space<vmem>>, vector<1x16x16xf32>
    %5 = vector.shape_cast %4 : vector<1x16x16xf32> to vector<16x16xf32>
    %cst = arith.constant dense<0.000000e+00> : vector<16x16xf32>
    %6 = tpu.matmul %3, %3, %cst {dimension_numbers = #tpu.dot_dimension_numbers<[1], [1], [0], [0], [0, 0, 1, 0], [], []>} : vector<16x4096xf32>, vector<16x4096xf32>, vector<16x16xf32> -> vector<16x16xf32>
    %7 = arith.addf %5, %6 : vector<16x16xf32>
    %c0_5 = arith.constant 0 : index
    %c0_6 = arith.constant 0 : index
    %c0_7 = arith.constant 0 : index
    %8 = vector.load %arg3[%c0_5, %c0_6, %c0_7] : memref<1x16x16xf32, #tpu.memory_space<vmem>>, vector<1x16x16xf32>
    %9 = vector.shape_cast %8 : vector<1x16x16xf32> to vector<16x16xf32>
    %10 = vector.shape_cast %7 : vector<16x16xf32> to vector<1x16x16xf32>
    tpu.vector_store %arg3[%c0_5, %c0_6, %c0_7], %10 {strides = array<i32>} : memref<1x16x16xf32, #tpu.memory_space<vmem>>, vector<1x16x16xf32>,
    %c0_8 = arith.constant 0 : index
    %c0_9 = arith.constant 0 : index
    %c0_10 = arith.constant 0 : index
    %11 = vector.load %arg4[%c0_8, %c0_9, %c0_10] : memref<1x16x1xf32, #tpu.memory_space<vmem>>, vector<1x16x1xf32>
    %12 = vector.shape_cast %11 : vector<1x16x1xf32> to vector<16x1xf32>
    %cst_11 = arith.constant dense<0.000000e+00> : vector<16xf32>
    %13 = vector.multi_reduction <add>, %3, %cst_11 [1] : vector<16x4096xf32> to vector<16xf32>
    %14 = vector.shape_cast %13 : vector<16xf32> to vector<16x1xf32>
    %15 = arith.addf %12, %14 : vector<16x1xf32>
    %c0_12 = arith.constant 0 : index
    %c0_13 = arith.constant 0 : index
    %c0_14 = arith.constant 0 : index
    %16 = vector.load %arg4[%c0_12, %c0_13, %c0_14] : memref<1x16x1xf32, #tpu.memory_space<vmem>>, vector<1x16x1xf32>
    %17 = vector.shape_cast %16 : vector<1x16x1xf32> to vector<16x1xf32>
    %18 = vector.shape_cast %15 : vector<16x1xf32> to vector<1x16x1xf32>
    tpu.vector_store %arg4[%c0_12, %c0_13, %c0_14], %18 {strides = array<i32>} : memref<1x16x1xf32, #tpu.memory_space<vmem>>, vector<1x16x1xf32>,
    return
  }
  func.func @transform_0(%arg0: i32, %arg1: i32) -> (i32, i32) {
    %c1_i32 = arith.constant 1 : i32
    %0 = arith.muli %arg0, %c1_i32 : i32
    %1 = arith.addi %0, %arg1 : i32
    %c0_i32 = arith.constant 0 : i32
    %c0_i32_0 = arith.constant 0 : i32
    return %c0_i32, %1 : i32, i32
  }
  func.func @transform_1(%arg0: i32, %arg1: i32) -> (i32, i32, i32) {
    %c0_i32 = arith.constant 0 : i32
    %c0_i32_0 = arith.constant 0 : i32
    %c0_i32_1 = arith.constant 0 : i32
    return %arg0, %c0_i32, %c0_i32_0 : i32, i32, i32
  }
  func.func @transform_2(%arg0: i32, %arg1: i32) -> (i32, i32, i32) {
    %c0_i32 = arith.constant 0 : i32
    %c0_i32_0 = arith.constant 0 : i32
    %c0_i32_1 = arith.constant 0 : i32
    return %arg0, %c0_i32, %c0_i32_0 : i32, i32, i32
  }
}

</mosaic_0001>

<bundles_post_ra>
// kernel: tpu_custom_call.1
= control target key start
LH: loop header
LB: loop body
LE: loop exit
PB: predicated region body
PF: predicated region fallthrough
CT: control target
= control target key end

     0   :  { %8 = vsyncpa [#allocation3], 0  ;;  %s1179_s0 = inlined_call_operand.hbm [shape: f32[16,4096], index: 0, kind: input, shape index: {}]   ;;  %s1180_s1 = inlined_call_operand.hbm [shape: f32[1,16,16], index: 1, kind: output, shape index: {0}]   ;;  %s1181_s2 = inlined_call_operand.vmem [shape: f32[1,16,1], index: 2, kind: output, shape index: {1}]  }
   0x1   :  { %9 = vsyncpa [#allocation4], 0  ;;  %s18_s11 = sshll.u32 %s1179_s0, 4  ;;  %s1005_s12 = smov [#allocation2]   ;;  %s19_s11 = int_to_ptr.hbm [resolvable:$true] %s18_s11 }
   0x2   :  { %s20_s13 = sshll.u32 %s1005_s12, 4  ;;  %s1006_s14 = smov 4096   ;;  %s21_s13 = int_to_ptr.vmem [resolvable:$true] %s20_s13 }
   0x3   :  { %s1007_s15 = smov 256  }
   0x4   :  { %26 = dma.hbm_to_vmem [thread:$0]  %s19_s11, 8192, %s21_s13, [#allocation3], %s1006_s14, %s1006_s14, %s1007_s15  }
   0x5   :  { %1001 = dma.done.wait [#allocation3], 8192  }
   0x6   :  { %1002 = vsyncadd [#allocation3], 4294959104  ;;  %v75_v0 = vld [vmem:[#allocation2 + $0x100] sm:$0xff]  ;;  %v77_v1 = vld [vmem:[#allocation2 + $0x110] sm:$0xff]  ;;  %vm37_vm0 = vcmask 130048   ;;  %vm40_vm1 = vcmask 7168  }
   0x7   :  { %v76_v2 = vld [vmem:[#allocation2 + $0x108] sm:$0xff]  ;;  %123 = vmatpush.xpose.msra.mxu0 %v75_v0  ;;  %169 = vmatpush.xpose.msra.mxu2 %v77_v1  ;;  %v78_v4 = vld [vmem:[#allocation2 + $0x118] sm:$0xff]  ;;  %v43_v5 = vld [vmem:[#allocation2] sm:$0xff]  ;;  %s929_s30 = sshll.u32 %s1180_s1, 4  ;;  %s1010_s3 = smov 128   ;;  %s930_s30 = int_to_ptr.hbm [resolvable:$true] %s929_s30 }
   0x8   :  { %v885_v3 = vadd.f32 %v76_v2, %v75_v0  ;;  %146 = vmatpush.xpose.msra.mxu1 %v76_v2  ;;  %192 = vmatpush.xpose.msra.mxu3 %v78_v4  ;;  %v45_v6 = vld [vmem:[#allocation2 + $0x10] sm:$0xff]  ;;  %v44_v7 = vld [vmem:[#allocation2 + $0x8] sm:$0xff]  ;;  %v46_v10 = vld [vmem:[#allocation2 + $0x18] sm:$0xff]  ;;  %s1011_s4 = smov 8  }
   0x9   :  { %v852_v9 = vadd.f32 %v44_v7, %v43_v5  ;;  %v1030_v11 = vld [vmem:[#allocation2 + $0x130] sm:$0xff]  ;;  %v1032_v12 = vld [vmem:[#allocation2 + $0x120] sm:$0xff]  ;;  %v1036_v16 = vld [vmem:[#allocation2 + $0x138] sm:$0xff] }
   0xa   :  { %v886_v8 = vadd.f32 %v885_v3, %v77_v1  ;;  %v1038_v17 = vld [vmem:[#allocation2 + $0x128] sm:$0xff]  ;;  %v49_v18 = vld [vmem:[#allocation2 + $0x30] sm:$0xff]  ;;  %v47_v19 = vld [vmem:[#allocation2 + $0x20] sm:$0xff] }
   0xb   :  { %124 = vmatpush.xpose.msra.mxu0 %v43_v5  ;;  %170 = vmatpush.xpose.msra.mxu2 %v45_v6  ;;  %v853_v13 = vadd.f32 %v852_v9, %v45_v6  ;;  %v1040_v21 = vld [vmem:[#allocation2 + $0x150] sm:$0xff]  ;;  %v1042_v22 = vld [vmem:[#allocation2 + $0x140] sm:$0xff]  ;;  %v48_v23 = vld [vmem:[#allocation2 + $0x28] sm:$0xff] }
   0xc   :  { %147 = vmatpush.xpose.msra.mxu1 %v44_v7  ;;  %193 = vmatpush.xpose.msra.mxu3 %v46_v10  ;;  %v887_v14 = vadd.f32 %v886_v8, %v78_v4  ;;  %v50_v25 = vld [vmem:[#allocation2 + $0x38] sm:$0xff]  ;;  %v1051_v28 = vld [vmem:[#allocation2 + $0x148] sm:$0xff]  ;;  %v53_v31 = vld [vmem:[#allocation2 + $0x50] sm:$0xff] }
   0xd   :  { %v854_v15 = vadd.f32 %v853_v13, %v46_v10  ;;  %v1049_v27 = vld [vmem:[#allocation2 + $0x158] sm:$0xff]  ;;  %v51_v32 = vld [vmem:[#allocation2 + $0x40] sm:$0xff]  ;;  %v52_v35 = vld [vmem:[#allocation2 + $0x48] sm:$0xff] }
   0xe   :  { %125 = vmatmul.f32.vlgmr.msra.gmra.mxu0 %v43_v5  ;;  %171 = vmatmul.f32.vlgmr.msra.gmra.mxu2 %v45_v6  ;;  %v888_v24 = vadd.f32 %v887_v14, %v1032_v12  ;;  %v54_v34 = vld [vmem:[#allocation2 + $0x58] sm:$0xff]  ;;  %v1058_v40 = vld [vmem:[#allocation2 + $0x170] sm:$0xff]  ;;  %v1060_v41 = vld [vmem:[#allocation2 + $0x160] sm:$0xff] }
   0xf   :  { %261 = vmatpush.xpose.msrb.mxu2 %v1030_v11  ;;  %215 = vmatpush.xpose.msrb.mxu0 %v1032_v12  ;;  %v855_v20 = vadd.f32 %v854_v15, %v47_v19  ;;  %v1062_v42 = vld [vmem:[#allocation2 + $0x178] sm:$0xff]  ;;  %v1064_v43 = vld [vmem:[#allocation2 + $0x168] sm:$0xff]  ;;  %v57_v46 = vld [vmem:[#allocation2 + $0x70] sm:$0xff] }
  0x10   :  { %148 = vmatmul.f32.vlgmr.msra.gmra.mxu1 %v44_v7  ;;  %194 = vmatmul.f32.vlgmr.msra.gmra.mxu3 %v46_v10  ;;  %v889_v30 = vadd.f32 %v888_v24, %v1038_v17  ;;  %v55_v47 = vld [vmem:[#allocation2 + $0x60] sm:$0xff]  ;;  %v58_v48 = vld [vmem:[#allocation2 + $0x78] sm:$0xff]  ;;  %v56_v49 = vld [vmem:[#allocation2 + $0x68] sm:$0xff] }
  0x11   :  { %284 = vmatpush.xpose.msrb.mxu3 %v1036_v16  ;;  %238 = vmatpush.xpose.msrb.mxu1 %v1038_v17  ;;  %v856_v26 = vadd.f32 %v855_v20, %v48_v23  ;;  %v1078_v56 = vld [vmem:[#allocation2 + $0x190] sm:$0xff]  ;;  %v1080_v57 = vld [vmem:[#allocation2 + $0x180] sm:$0xff]  ;;  %v1082_v58 = vld [vmem:[#allocation2 + $0x198] sm:$0xff] }
  0x12   :  { %v890_v36 = vadd.f32 %v889_v30, %v1030_v11  ;;  %v1084_v59 = vld [vmem:[#allocation2 + $0x188] sm:$0xff]  ;;  %v61_v62 = vld [vmem:[#allocation2 + $0x90] sm:$0xff]  ;;  %v59_v63 = vld [vmem:[#allocation2 + $0x80] sm:$0xff] }
  0x13   :  { %262 = vmatpush.xpose.msrb.mxu2 %v49_v18  ;;  %216 = vmatpush.xpose.msrb.mxu0 %v47_v19  ;;  %v857_v29 = vadd.f32 %v856_v26, %v49_v18  ;;  %v1098_v8 = vld [vmem:[#allocation2 + $0x1b0] sm:$0xff]  ;;  %v1100_v9 = vld [vmem:[#allocation2 + $0x1a0] sm:$0xff]  ;;  %v1102_v10 = vld [vmem:[#allocation2 + $0x1b8] sm:$0xff] }
  0x14   :  { %v891_v38 = vadd.f32 %v890_v36, %v1036_v16  ;;  %v65_v14 = vld [vmem:[#allocation2 + $0xb0] sm:$0xff]  ;;  %v63_v15 = vld [vmem:[#allocation2 + $0xa0] sm:$0xff]  ;;  %v1122_v26 = vld [vmem:[#allocation2 + $0x1d8] sm:$0xff] }
  0x15   :  { %285 = vmatpush.xpose.msrb.mxu3 %v50_v25  ;;  %239 = vmatpush.xpose.msrb.mxu1 %v48_v23  ;;  %v858_v33 = vadd.f32 %v857_v29, %v50_v25  ;;  %v1118_v24 = vld [vmem:[#allocation2 + $0x1d0] sm:$0xff] }
  0x16   :  { %128 = vmatmul.f32.gmra.mxu0 %v75_v0  ;;  %174 = vmatmul.f32.gmra.mxu2 %v77_v1  ;;  %v892_v44 = vadd.f32 %v891_v38, %v1042_v22  ;;  %v62_v0 = vld [vmem:[#allocation2 + $0x98] sm:$0xff]  ;;  %v60_v1 = vld [vmem:[#allocation2 + $0x88] sm:$0xff]  ;;  %v69_v30 = vld [vmem:[#allocation2 + $0xd0] sm:$0xff] }
  0x17   :  { %353 = vmatpush.xpose.msra.mxu2 %v1040_v21  ;;  %307 = vmatpush.xpose.msra.mxu0 %v1042_v22  ;;  %v859_v37 = vadd.f32 %v858_v33, %v51_v32  ;;  %v68_v33 = vld [vmem:[#allocation2 + $0xc8] sm:$0xff] }
  0x18   :  { %151 = vmatmul.f32.gmra.mxu1 %v76_v2  ;;  %197 = vmatmul.f32.gmra.mxu3 %v78_v4  ;;  %v893_v50 = vadd.f32 %v892_v44, %v1051_v28 }
  0x19   :  { %376 = vmatpush.xpose.msra.mxu3 %v1049_v27  ;;  %330 = vmatpush.xpose.msra.mxu1 %v1051_v28  ;;  %v860_v39 = vadd.f32 %v859_v37, %v52_v35 }
  0x1a   :  { %v894_v52 = vadd.f32 %v893_v50, %v1040_v21 }
  0x1b   :  { %354 = vmatpush.xpose.msra.mxu2 %v53_v31  ;;  %308 = vmatpush.xpose.msra.mxu0 %v51_v32  ;;  %v861_v45 = vadd.f32 %v860_v39, %v53_v31 }
  0x1c   :  { %v895_v54 = vadd.f32 %v894_v52, %v1049_v27 }
  0x1d   :  { %377 = vmatpush.xpose.msra.mxu3 %v54_v34  ;;  %331 = vmatpush.xpose.msra.mxu1 %v52_v35  ;;  %v862_v51 = vadd.f32 %v861_v45, %v54_v34 }
  0x1e   :  { %217 = vmatmul.f32.vlgmr.msrb.gmra.mxu0 %v47_v19  ;;  %263 = vmatmul.f32.vlgmr.msrb.gmra.mxu2 %v49_v18  ;;  %v896_v60 = vadd.f32 %v895_v54, %v1060_v41 }
  0x1f   :  { %445 = vmatpush.xpose.msrb.mxu2 %v1058_v40  ;;  %399 = vmatpush.xpose.msrb.mxu0 %v1060_v41  ;;  %v863_v53 = vadd.f32 %v862_v51, %v55_v47 }
  0x20   :  { %240 = vmatmul.f32.vlgmr.msrb.gmra.mxu1 %v48_v23  ;;  %286 = vmatmul.f32.vlgmr.msrb.gmra.mxu3 %v50_v25  ;;  %v897_v2 = vadd.f32 %v896_v60, %v1064_v43  ;;  %v1120_v25 = vld [vmem:[#allocation2 + $0x1c0] sm:$0xff] }
  0x21   :  { %468 = vmatpush.xpose.msrb.mxu3 %v1062_v42  ;;  %422 = vmatpush.xpose.msrb.mxu1 %v1064_v43  ;;  %v864_v55 = vadd.f32 %v863_v53, %v56_v49 }
  0x22   :  { %v898_v4 = vadd.f32 %v897_v2, %v1058_v40 }
  0x23   :  { %446 = vmatpush.xpose.msrb.mxu2 %v57_v46  ;;  %400 = vmatpush.xpose.msrb.mxu0 %v55_v47  ;;  %v865_v61 = vadd.f32 %v864_v55, %v57_v46 }
  0x24   :  { %v899_v6 = vadd.f32 %v898_v4, %v1062_v42 }
  0x25   :  { %469 = vmatpush.xpose.msrb.mxu3 %v58_v48  ;;  %423 = vmatpush.xpose.msrb.mxu1 %v56_v49  ;;  %v866_v3 = vadd.f32 %v865_v61, %v58_v48 }
  0x26   :  { %220 = vmatmul.f32.gmra.mxu0 %v1032_v12  ;;  %266 = vmatmul.f32.gmra.mxu2 %v1030_v11  ;;  %v1104_v11 = vld [vmem:[#allocation2 + $0x1a8] sm:$0xff]  ;;  %v900_v12 = vadd.f32 %v899_v6, %v1080_v57 }
  0x27   :  { %v867_v5 = vadd.f32 %v866_v3, %v59_v63 }
  0x28   :  { %243 = vmatmul.f32.gmra.mxu1 %v1038_v17  ;;  %289 = vmatmul.f32.gmra.mxu3 %v1036_v16  ;;  %v66_v16 = vld [vmem:[#allocation2 + $0xb8] sm:$0xff]  ;;  %v64_v17 = vld [vmem:[#allocation2 + $0xa8] sm:$0xff]  ;;  %v901_v18 = vadd.f32 %v900_v12, %v1084_v59 }
  0x29   :  { %v868_v7 = vadd.f32 %v867_v5, %v60_v1 }
  0x2a   :  { %v902_v20 = vadd.f32 %v901_v18, %v1078_v56 }
  0x2b   :  { %v869_v13 = vadd.f32 %v868_v7, %v61_v62 }
  0x2d   :  { %v870_v19 = vadd.f32 %v869_v13, %v62_v0 }
  0x2e   :  { %309 = vmatmul.f32.vlgmr.msra.gmra.mxu0 %v51_v32  ;;  %355 = vmatmul.f32.vlgmr.msra.gmra.mxu2 %v53_v31  ;;  %v67_v31 = vld [vmem:[#allocation2 + $0xc0] sm:$0xff]  ;;  %v70_v32 = vld [vmem:[#allocation2 + $0xd8] sm:$0xff] }
  0x2f   :  { %537 = vmatpush.xpose.msra.mxu2 %v1078_v56  ;;  %491 = vmatpush.xpose.msra.mxu0 %v1080_v57 }
  0x30   :  { %332 = vmatmul.f32.vlgmr.msra.gmra.mxu1 %v52_v35  ;;  %378 = vmatmul.f32.vlgmr.msra.gmra.mxu3 %v54_v34 }
  0x31   :  { %560 = vmatpush.xpose.msra.mxu3 %v1082_v58  ;;  %514 = vmatpush.xpose.msra.mxu1 %v1084_v59 }
  0x33   :  { %538 = vmatpush.xpose.msra.mxu2 %v61_v62  ;;  %492 = vmatpush.xpose.msra.mxu0 %v59_v63 }
  0x35   :  { %561 = vmatpush.xpose.msra.mxu3 %v62_v0  ;;  %515 = vmatpush.xpose.msra.mxu1 %v60_v1 }
  0x36   :  { %312 = vmatmul.f32.gmra.mxu0 %v1042_v22  ;;  %358 = vmatmul.f32.gmra.mxu2 %v1040_v21  ;;  %v871_v21 = vadd.f32 %v870_v19, %v63_v15  ;;  %v903_v22 = vadd.f32 %v902_v20, %v1082_v58 }
  0x38   :  { %335 = vmatmul.f32.gmra.mxu1 %v1051_v28  ;;  %381 = vmatmul.f32.gmra.mxu3 %v1049_v27  ;;  %v872_v23 = vadd.f32 %v871_v21, %v64_v17  ;;  %v1124_v27 = vld [vmem:[#allocation2 + $0x1c8] sm:$0xff]  ;;  %v904_v28 = vadd.f32 %v903_v22, %v1100_v9 }
  0x3a   :  { %v873_v29 = vadd.f32 %v872_v23, %v65_v14  ;;  %v905_v34 = vadd.f32 %v904_v28, %v1104_v11 }
  0x3c   :  { %v874_v35 = vadd.f32 %v873_v29, %v66_v16  ;;  %v906_v36 = vadd.f32 %v905_v34, %v1098_v8 }
  0x3e   :  { %401 = vmatmul.f32.vlgmr.msrb.gmra.mxu0 %v55_v47  ;;  %447 = vmatmul.f32.vlgmr.msrb.gmra.mxu2 %v57_v46  ;;  %v875_v37 = vadd.f32 %v874_v35, %v67_v31  ;;  %v907_v38 = vadd.f32 %v906_v36, %v1102_v10  ;;  %v73_v46 = vld [vmem:[#allocation2 + $0xf0] sm:$0xff]  ;;  %v71_v47 = vld [vmem:[#allocation2 + $0xe0] sm:$0xff] }
  0x3f   :  { %629 = vmatpush.xpose.msrb.mxu2 %v1098_v8  ;;  %583 = vmatpush.xpose.msrb.mxu0 %v1100_v9 }
  0x40   :  { %424 = vmatmul.f32.vlgmr.msrb.gmra.mxu1 %v56_v49  ;;  %470 = vmatmul.f32.vlgmr.msrb.gmra.mxu3 %v58_v48  ;;  %v876_v39 = vadd.f32 %v875_v37, %v68_v33  ;;  %v908_v44 = vadd.f32 %v907_v38, %v1120_v25  ;;  %v74_v48 = vld [vmem:[#allocation2 + $0xf8] sm:$0xff]  ;;  %v72_v49 = vld [vmem:[#allocation2 + $0xe8] sm:$0xff] }
  0x41   :  { %652 = vmatpush.xpose.msrb.mxu3 %v1102_v10  ;;  %606 = vmatpush.xpose.msrb.mxu1 %v1104_v11 }
  0x42   :  { %v877_v45 = vadd.f32 %v876_v39, %v69_v30  ;;  %v909_v50 = vadd.f32 %v908_v44, %v1124_v27 }
  0x43   :  { %630 = vmatpush.xpose.msrb.mxu2 %v65_v14  ;;  %584 = vmatpush.xpose.msrb.mxu0 %v63_v15 }
  0x44   :  { %v878_v51 = vadd.f32 %v877_v45, %v70_v32  ;;  %v910_v52 = vadd.f32 %v909_v50, %v1118_v24 }
  0x45   :  { %653 = vmatpush.xpose.msrb.mxu3 %v66_v16  ;;  %607 = vmatpush.xpose.msrb.mxu1 %v64_v17 }
  0x46   :  { %404 = vmatmul.f32.gmra.mxu0 %v1060_v41  ;;  %450 = vmatmul.f32.gmra.mxu2 %v1058_v40  ;;  %v105_v40 = vld [vmem:[#allocation2 + $0x1f0] sm:$0xff]  ;;  %v103_v41 = vld [vmem:[#allocation2 + $0x1e0] sm:$0xff]  ;;  %v879_v53 = vadd.f32 %v878_v51, %v71_v47  ;;  %v911_v54 = vadd.f32 %v910_v52, %v1122_v26 }
  0x48   :  { %427 = vmatmul.f32.gmra.mxu1 %v1064_v43  ;;  %473 = vmatmul.f32.gmra.mxu3 %v1062_v42  ;;  %v106_v42 = vld [vmem:[#allocation2 + $0x1f8] sm:$0xff]  ;;  %v104_v43 = vld [vmem:[#allocation2 + $0x1e8] sm:$0xff]  ;;  %v880_v55 = vadd.f32 %v879_v53, %v72_v49 }
  0x4e   :  { %493 = vmatmul.f32.vlgmr.msra.gmra.mxu0 %v59_v63  ;;  %539 = vmatmul.f32.vlgmr.msra.gmra.mxu2 %v61_v62 }
  0x4f   :  { %721 = vmatpush.xpose.msra.mxu2 %v1118_v24  ;;  %675 = vmatpush.xpose.msra.mxu0 %v1120_v25 }
  0x50   :  { %516 = vmatmul.f32.vlgmr.msra.gmra.mxu1 %v60_v1  ;;  %562 = vmatmul.f32.vlgmr.msra.gmra.mxu3 %v62_v0 }
  0x51   :  { %744 = vmatpush.xpose.msra.mxu3 %v1122_v26  ;;  %698 = vmatpush.xpose.msra.mxu1 %v1124_v27 }
  0x53   :  { %722 = vmatpush.xpose.msra.mxu2 %v69_v30  ;;  %676 = vmatpush.xpose.msra.mxu0 %v67_v31 }
  0x55   :  { %745 = vmatpush.xpose.msra.mxu3 %v70_v32  ;;  %699 = vmatpush.xpose.msra.mxu1 %v68_v33 }
  0x56   :  { %496 = vmatmul.f32.gmra.mxu0 %v1080_v57  ;;  %542 = vmatmul.f32.gmra.mxu2 %v1078_v56  ;;  %v881_v56 = vadd.f32 %v880_v55, %v73_v46  ;;  %v912_v57 = vadd.f32 %v911_v54, %v103_v41 }
  0x58   :  { %519 = vmatmul.f32.gmra.mxu1 %v1084_v59  ;;  %565 = vmatmul.f32.gmra.mxu3 %v1082_v58  ;;  %v882_v58 = vadd.f32 %v881_v56, %v74_v48  ;;  %v913_v59 = vadd.f32 %v912_v57, %v104_v43 }
  0x5a   :  { %883 = vadd.xlane.f32.xlu0 %v882_v58  ;;  %v914_v60 = vadd.f32 %v913_v59, %v105_v40 }
  0x5c   :  { %v915_v61 = vadd.f32 %v914_v60, %v106_v42 }
  0x5e   :  { %585 = vmatmul.f32.vlgmr.msrb.gmra.mxu0 %v63_v15  ;;  %631 = vmatmul.f32.vlgmr.msrb.gmra.mxu2 %v65_v14 }
  0x5f   :  { %813 = vmatpush.xpose.msrb.mxu2 %v105_v40  ;;  %767 = vmatpush.xpose.msrb.mxu0 %v103_v41 }
  0x60   :  { %608 = vmatmul.f32.vlgmr.msrb.gmra.mxu1 %v64_v17  ;;  %654 = vmatmul.f32.vlgmr.msrb.gmra.mxu3 %v66_v16 }
  0x61   :  { %836 = vmatpush.xpose.msrb.mxu3 %v106_v42  ;;  %790 = vmatpush.xpose.msrb.mxu1 %v104_v43 }
  0x62   :  { %916 = vadd.xlane.f32.xlu0 %v915_v61 }
  0x63   :  { %814 = vmatpush.xpose.msrb.mxu2 %v73_v46  ;;  %768 = vmatpush.xpose.msrb.mxu0 %v71_v47 }
  0x65   :  { %837 = vmatpush.xpose.msrb.mxu3 %v74_v48  ;;  %791 = vmatpush.xpose.msrb.mxu1 %v72_v49 }
  0x66   :  { %588 = vmatmul.f32.gmra.mxu0 %v1100_v9  ;;  %634 = vmatmul.f32.gmra.mxu2 %v1098_v8 }
  0x68   :  { %611 = vmatmul.f32.gmra.mxu1 %v1104_v11  ;;  %657 = vmatmul.f32.gmra.mxu3 %v1102_v10 }
  0x6e   :  { %677 = vmatmul.f32.vlgmr.msra.gmra.mxu0 %v67_v31  ;;  %723 = vmatmul.f32.vlgmr.msra.gmra.mxu2 %v69_v30 }
  0x70   :  { %700 = vmatmul.f32.vlgmr.msra.gmra.mxu1 %v68_v33  ;;  %746 = vmatmul.f32.vlgmr.msra.gmra.mxu3 %v70_v32 }
  0x76   :  { %680 = vmatmul.f32.gmra.mxu0 %v1120_v25  ;;  %726 = vmatmul.f32.gmra.mxu2 %v1118_v24 }
  0x78   :  { %703 = vmatmul.f32.gmra.mxu1 %v1124_v27  ;;  %749 = vmatmul.f32.gmra.mxu3 %v1122_v26 }
  0x7e   :  { %769 = vmatmul.f32.vlgmr.msrb.gmra.mxu0 %v71_v47  ;;  %815 = vmatmul.f32.vlgmr.msrb.gmra.mxu2 %v73_v46 }
  0x80   :  { %792 = vmatmul.f32.vlgmr.msrb.gmra.mxu1 %v72_v49  ;;  %838 = vmatmul.f32.vlgmr.msrb.gmra.mxu3 %v74_v48 }
  0x86   :  { %772 = vmatmul.f32.gmra.mxu0 %v103_v41  ;;  %818 = vmatmul.f32.gmra.mxu2 %v105_v40 }
  0x88   :  { %795 = vmatmul.f32.gmra.mxu1 %v104_v43  ;;  %841 = vmatmul.f32.gmra.mxu3 %v106_v42 }
  0x8b   :  { %v126_v62 = vpop.f32.mrf.mxu0 }
  0x8d   :  { %v149_v63 = vpop.f32.mrf.mxu1 }
  0x8e   :  { %v150_v15 = vadd.f32 %v149_v63, %v126_v62 }
  0x91   :  { %v172_v0 = vpop.f32.mrf.mxu2 }
  0x92   :  { %v173_v17 = vadd.f32 %v172_v0, %v150_v15 }
  0x93   :  { %v195_v1 = vpop.f32.mrf.mxu3  ;;  %v129_v2 = vpop.f32.mrf.mxu0 }
  0x94   :  { %v196_v19 = vadd.f32 %v195_v1, %v173_v17 }
  0x95   :  { %v152_v3 = vpop.f32.mrf.mxu1 }
  0x96   :  { %v153_v22 = vadd.f32 %v152_v3, %v129_v2 }
  0x99   :  { %v175_v4 = vpop.f32.mrf.mxu2 }
  0x9a   :  { %v176_v25 = vadd.f32 %v175_v4, %v153_v22 }
  0x9b   :  { %v198_v5 = vpop.f32.mrf.mxu3  ;;  %v218_v6 = vpop.f32.mrf.mxu0 }
  0x9c   :  { %v219_v23 = vadd.f32 %v218_v6, %v196_v19  ;;  %v199_v28 = vadd.f32 %v198_v5, %v176_v25 }
  0x9d   :  { %v241_v7 = vpop.f32.mrf.mxu1 }
  0x9e   :  { %v242_v26 = vadd.f32 %v241_v7, %v219_v23 }
  0xa1   :  { %v264_v8 = vpop.f32.mrf.mxu2 }
  0xa2   :  { %v265_v29 = vadd.f32 %v264_v8, %v242_v26 }
  0xa3   :  { %v287_v9 = vpop.f32.mrf.mxu3  ;;  %v221_v10 = vpop.f32.mrf.mxu0 }
  0xa4   :  { %v222_v32 = vadd.f32 %v221_v10, %v199_v28  ;;  %v288_v34 = vadd.f32 %v287_v9, %v265_v29  ;;  %v1008_v9 = vmov 0.0  }
  0xa5   :  { %v244_v11 = vpop.f32.mrf.mxu1  ;;  %38 = vst.msk [vmem:[#allocation5] sm:$0xff] %vm37_vm0, %v1008_v9 }
  0xa6   :  { %v245_v35 = vadd.f32 %v244_v11, %v222_v32  ;;  %39 = vst.msk [vmem:[#allocation5 + $0x8] sm:$0xff] %vm37_vm0, %v1008_v9 }
  0xa7   :  { %41 = vst.msk [vmem:[%s1181_s2] sm:$0xff] %vm40_vm1, %v1008_v9 }
  0xa8   :  { %42 = vst.msk [vmem:[%s1181_s2 + $0x8] sm:$0xff] %vm40_vm1, %v1008_v9 }
  0xa9   :  { %v267_v12 = vpop.f32.mrf.mxu2 }
  0xaa   :  { %v268_v38 = vadd.f32 %v267_v12, %v245_v35 }
  0xab   :  { %v290_v13 = vpop.f32.mrf.mxu3  ;;  %v310_v14 = vpop.f32.mrf.mxu0 }
  0xac   :  { %v311_v36 = vadd.f32 %v310_v14, %v288_v34  ;;  %v291_v43 = vadd.f32 %v290_v13, %v268_v38 }
  0xad   :  { %v333_v16 = vpop.f32.mrf.mxu1 }
  0xae   :  { %v334_v41 = vadd.f32 %v333_v16, %v311_v36 }
  0xaf   :  { %v851_v32 = vld [vmem:[%s1181_s2 + $0x8] sm:$0xff] }
  0xb1   :  { %v356_v18 = vpop.f32.mrf.mxu2 }
  0xb2   :  { %v357_v44 = vadd.f32 %v356_v18, %v334_v41 }
  0xb3   :  { %v379_v20 = vpop.f32.mrf.mxu3  ;;  %v313_v21 = vpop.f32.mrf.mxu0 }
  0xb4   :  { %v314_v45 = vadd.f32 %v313_v21, %v291_v43  ;;  %v380_v47 = vadd.f32 %v379_v20, %v357_v44  ;;  %v850_v20 = vld [vmem:[%s1181_s2] sm:$0xff] }
  0xb5   :  { %v336_v24 = vpop.f32.mrf.mxu1 }
  0xb6   :  { %v337_v50 = vadd.f32 %v336_v24, %v314_v45 }
  0xb9   :  { %v359_v27 = vpop.f32.mrf.mxu2 }
  0xba   :  { %v360_v53 = vadd.f32 %v359_v27, %v337_v50 }
  0xbb   :  { %v382_v30 = vpop.f32.mrf.mxu3  ;;  %v402_v31 = vpop.f32.mrf.mxu0 }
  0xbc   :  { %v403_v51 = vadd.f32 %v402_v31, %v380_v47  ;;  %v383_v56 = vadd.f32 %v382_v30, %v360_v53 }
  0xbd   :  { %v425_v33 = vpop.f32.mrf.mxu1 }
  0xbe   :  { %v426_v54 = vadd.f32 %v425_v33, %v403_v51 }
  0xc1   :  { %v448_v37 = vpop.f32.mrf.mxu2 }
  0xc2   :  { %v449_v57 = vadd.f32 %v448_v37, %v426_v54 }
  0xc3   :  { %v471_v39 = vpop.f32.mrf.mxu3  ;;  %v405_v40 = vpop.f32.mrf.mxu0 }
  0xc4   :  { %v406_v60 = vadd.f32 %v405_v40, %v383_v56  ;;  %v472_v62 = vadd.f32 %v471_v39, %v449_v57 }
  0xc5   :  { %v428_v42 = vpop.f32.mrf.mxu1 }
  0xc6   :  { %v429_v63 = vadd.f32 %v428_v42, %v406_v60 }
  0xc9   :  { %v451_v46 = vpop.f32.mrf.mxu2 }
  0xca   :  { %v452_v2 = vadd.f32 %v451_v46, %v429_v63 }
  0xcb   :  { %v474_v48 = vpop.f32.mrf.mxu3  ;;  %v494_v49 = vpop.f32.mrf.mxu0 }
  0xcc   :  { %v495_v0 = vadd.f32 %v494_v49, %v472_v62  ;;  %v475_v7 = vadd.f32 %v474_v48, %v452_v2 }
  0xcd   :  { %v517_v52 = vpop.f32.mrf.mxu1  ;;  %v884_v19 = vpop.xlane.xlu0 %883 }
  0xce   :  { %v518_v5 = vadd.f32 %v517_v52, %v495_v0  ;;  %v918_v22 = vadd.f32 %v884_v19, %v850_v20 }
  0xd0   :  { %921 = vst.msk [vmem:[%s1181_s2] sm:$0xff] %vm40_vm1, %v918_v22 }
  0xd1   :  { %v540_v55 = vpop.f32.mrf.mxu2 }
  0xd2   :  { %v541_v8 = vadd.f32 %v540_v55, %v518_v5 }
  0xd3   :  { %v563_v58 = vpop.f32.mrf.mxu3  ;;  %v497_v59 = vpop.f32.mrf.mxu0 }
  0xd4   :  { %v498_v10 = vadd.f32 %v497_v59, %v475_v7  ;;  %v564_v12 = vadd.f32 %v563_v58, %v541_v8  ;;  %v107_v59 = vld [vmem:[#allocation5] sm:$0xff] }
  0xd5   :  { %v520_v61 = vpop.f32.mrf.mxu1  ;;  %v917_v31 = vpop.xlane.xlu0 %916 }
  0xd6   :  { %v521_v15 = vadd.f32 %v520_v61, %v498_v10  ;;  %v919_v33 = vadd.f32 %v917_v31, %v851_v32 }
  0xd8   :  { %922 = vst.msk [vmem:[%s1181_s2 + $0x8] sm:$0xff] %vm40_vm1, %v919_v33  ;;  %s1009_s2 = smov [#allocation5]  }
  0xd9   :  { %v543_v1 = vpop.f32.mrf.mxu2  ;;  %s927_s27 = sshll.u32 %s1009_s2, 4  ;;  %s928_s27 = int_to_ptr.vmem [resolvable:$true] %s927_s27 }
  0xda   :  { %v544_v18 = vadd.f32 %v543_v1, %v521_v15 }
  0xdb   :  { %v566_v3 = vpop.f32.mrf.mxu3  ;;  %v586_v4 = vpop.f32.mrf.mxu0 }
  0xdc   :  { %v587_v16 = vadd.f32 %v586_v4, %v564_v12  ;;  %v567_v24 = vadd.f32 %v566_v3, %v544_v18  ;;  %v108_v4 = vld [vmem:[#allocation5 + $0x8] sm:$0xff] }
  0xdd   :  { %v609_v6 = vpop.f32.mrf.mxu1 }
  0xde   :  { %v610_v21 = vadd.f32 %v609_v6, %v587_v16 }
  0xe1   :  { %v632_v11 = vpop.f32.mrf.mxu2 }
  0xe2   :  { %v633_v25 = vadd.f32 %v632_v11, %v610_v21 }
  0xe3   :  { %v655_v13 = vpop.f32.mrf.mxu3  ;;  %v589_v14 = vpop.f32.mrf.mxu0 }
  0xe4   :  { %v590_v28 = vadd.f32 %v589_v14, %v567_v24  ;;  %v656_v30 = vadd.f32 %v655_v13, %v633_v25 }
  0xe5   :  { %v612_v17 = vpop.f32.mrf.mxu1 }
  0xe6   :  { %v613_v34 = vadd.f32 %v612_v17, %v590_v28 }
  0xe9   :  { %v635_v23 = vpop.f32.mrf.mxu2 }
  0xea   :  { %v636_v37 = vadd.f32 %v635_v23, %v613_v34 }
  0xeb   :  { %v658_v26 = vpop.f32.mrf.mxu3  ;;  %v678_v27 = vpop.f32.mrf.mxu0 }
  0xec   :  { %v679_v35 = vadd.f32 %v678_v27, %v656_v30  ;;  %v659_v42 = vadd.f32 %v658_v26, %v636_v37 }
  0xed   :  { %v701_v29 = vpop.f32.mrf.mxu1 }
  0xee   :  { %v702_v40 = vadd.f32 %v701_v29, %v679_v35 }
  0xf1   :  { %v724_v36 = vpop.f32.mrf.mxu2 }
  0xf2   :  { %v725_v43 = vadd.f32 %v724_v36, %v702_v40 }
  0xf3   :  { %v747_v38 = vpop.f32.mrf.mxu3  ;;  %v681_v39 = vpop.f32.mrf.mxu0 }
  0xf4   :  { %v682_v44 = vadd.f32 %v681_v39, %v659_v42  ;;  %v748_v46 = vadd.f32 %v747_v38, %v725_v43 }
  0xf5   :  { %v704_v41 = vpop.f32.mrf.mxu1 }
  0xf6   :  { %v705_v49 = vadd.f32 %v704_v41, %v682_v44 }
  0xf9   :  { %v727_v45 = vpop.f32.mrf.mxu2 }
  0xfa   :  { %v728_v52 = vadd.f32 %v727_v45, %v705_v49 }
  0xfb   :  { %v750_v47 = vpop.f32.mrf.mxu3  ;;  %v770_v48 = vpop.f32.mrf.mxu0 }
  0xfc   :  { %v771_v50 = vadd.f32 %v770_v48, %v748_v46  ;;  %v751_v55 = vadd.f32 %v750_v47, %v728_v52 }
  0xfd   :  { %v793_v51 = vpop.f32.mrf.mxu1 }
  0xfe   :  { %v794_v53 = vadd.f32 %v793_v51, %v771_v50 }
 0x101   :  { %v816_v54 = vpop.f32.mrf.mxu2 }
 0x102   :  { %v817_v56 = vadd.f32 %v816_v54, %v794_v53 }
 0x103   :  { %v839_v57 = vpop.f32.mrf.mxu3  ;;  %v773_v58 = vpop.f32.mrf.mxu0 }
 0x104   :  { %v774_v60 = vadd.f32 %v773_v58, %v751_v55  ;;  %v840_v61 = vadd.f32 %v839_v57, %v817_v56 }
 0x105   :  { %v796_v62 = vpop.f32.mrf.mxu1 }
 0x106   :  { %v845_v63 = vadd.f32 %v840_v61, %v107_v59  ;;  %v797_v0 = vadd.f32 %v796_v62, %v774_v60 }
 0x108   :  { %848 = vst.msk [vmem:[#allocation5] sm:$0xff] %vm37_vm0, %v845_v63 }
 0x109   :  { %v819_v1 = vpop.f32.mrf.mxu2 }
 0x10a   :  { %v820_v2 = vadd.f32 %v819_v1, %v797_v0 }
 0x10b   :  { %v842_v3 = vpop.f32.mrf.mxu3 }
 0x10c   :  { %v843_v5 = vadd.f32 %v842_v3, %v820_v2 }
 0x10e   :  { %v846_v6 = vadd.f32 %v843_v5, %v108_v4 }
 0x110   :  { %849 = vst.msk [vmem:[#allocation5 + $0x8] sm:$0xff] %vm37_vm0, %v846_v6 }
 0x111   :  { %935 = dma.vmem_to_hbm [thread:$0]  %s928_s27, 256, %s930_s30, [#allocation4], %s1010_s3, %s1010_s3, %s1011_s4  }
 0x112   :  { %1003 = dma.done.wait [#allocation4], 256  }
 0x113   :  { %1004 = vsyncadd [#allocation4], 4294967040 }
 0x114   :  { %944 = vsyncpa [#allocation3], 1 }
 0x115   :  { %945 = vsyncpa [#allocation4], 1 }

</bundles_post_ra>
